<compile_context>
chip_gen: v7x
topology: tpu7x:2x2x1
jax: 0.10.0
libtpu: 0.0.40
codegen_flags: <defaults>
</compile_context>

<pallas_src>
import functools

import numpy as np
import jax
import jax.numpy as jnp
from jax.experimental import pallas as pl
from jax.experimental.pallas import tpu as pltpu


# ----------------------------- fused Pallas kernel -------------------------- #

def _basic_block_kernel(*refs, enable_residual):
    """Fused Conv+BN+ReLU -> Conv+BN+ReLU -> MaxPool2d(2,2) (+ 0.5x-bilinear residual).

    Refs (rows = stacked batch-tile image rows, lanes = W*C):
      x_ref:     (M, W*Cin)          bf16 input rows (M = B_TILE*H)
      s_ref:     (K, M, M)           f32 block-diagonal row-shift ops (seam-aware)
      b1_ref:    (K, W*Cin,  W*Cout) bf16 conv1 row-band matrices (BN scale folded)
      bias1_ref: (1, W*Cout)         f32 folded BN bias, tiled across W
      b2_ref:    (K, W*Cout, W*Cout) bf16 conv2 row-band matrices
      bias2_ref: (1, W*Cout)         f32
      se_ref:    (W*Cout, Wo*Cout)   f32 even-w selector (horizontal max pool)
      so_ref:    (W*Cout, Wo*Cout)   f32 odd-w selector
      [savg_ref: (W*Cin, Wo*Cin)     f32 0.25*(Se+So) — only when residual enabled]
      o_ref:     (Mo, Wo*Cout)       f32 pooled output rows (Mo = M//2)
      acc_ref:   (M, W*Cout)         f32 VMEM scratch accumulator
    """
    if enable_residual:
        (x_ref, s_ref, b1_ref, bias1_ref, b2_ref, bias2_ref,
         se_ref, so_ref, savg_ref, o_ref, acc_ref) = refs
    else:
        (x_ref, s_ref, b1_ref, bias1_ref, b2_ref, bias2_ref,
         se_ref, so_ref, o_ref, acc_ref) = refs
        savg_ref = None

    K = b1_ref.shape[0]
    p = K // 2
    M = x_ref.shape[0]
    WC2 = b1_ref.shape[2]
    Mo = M // 2

    x = x_ref[...]                                      # (M, W*Cin) bf16

    def conv_bn_relu(lhs, b_ref, bias_ref):
        # K band matmuls (contraction = W*Cin_layer); the kh row offset and the
        # zeroing of rows that would cross image seams are applied by the
        # block-diagonal shift operator S[kh] on the MXU (exact 0/1 selection).
        for kh in range(K):
            z = jnp.dot(lhs, b_ref[kh], preferred_element_type=jnp.float32)
            if kh != p:
                z = jnp.dot(s_ref[kh], z, preferred_element_type=jnp.float32)
            if kh == 0:
                acc_ref[...] = z
            else:
                acc_ref[...] += z
        return jnp.maximum(acc_ref[...] + bias_ref[...], 0.0)

    # ---- conv1 + folded BN + ReLU  (intermediate never leaves VMEM) ---------
    y1 = conv_bn_relu(x, b1_ref, bias1_ref).astype(jnp.bfloat16)
    # ---- conv2 + folded BN + ReLU -------------------------------------------
    y2 = conv_bn_relu(y1, b2_ref, bias2_ref)            # (M, W*Cout) f32

    # ---- MaxPool2d(2, 2): vertical pairs on sublanes, horizontal via MXU ----
    v = y2.reshape(Mo, 2, WC2)
    yv = jnp.maximum(v[:, 0, :], v[:, 1, :])            # (Mo, W*Cout)
    pooled = jnp.maximum(
        jnp.dot(yv, se_ref[...], preferred_element_type=jnp.float32),
        jnp.dot(yv, so_ref[...], preferred_element_type=jnp.float32))

    if enable_residual:
        # bilinear 0.5x (align_corners=False) == 2x2 average pool; Savg holds 0.25*(Se+So)
        xf = x.astype(jnp.float32)
        u = xf.reshape(Mo, 2, xf.shape[1])
        us = u[:, 0, :] + u[:, 1, :]
        pooled = pooled + jnp.dot(us, savg_ref[...], preferred_element_type=jnp.float32)

    o_ref[...] = pooled


# ----------------------------- constant builders ----------------------------- #

def _fold_bn_into_conv(w, gamma, beta, mean, var, eps=1e-5):
    """Fold eval-mode BatchNorm into conv weights + bias (exact)."""
    scale = gamma / jnp.sqrt(var + eps)
    return w * scale[None, None, None, :], beta - mean * scale


def _build_row_band(w, W):
    """(K, K, Cin, Cout) HWIO weights -> K row-band matrices (K, W*Cin, W*Cout).

    B[kh, w_in*Cin + ci, wo*Cout + co] = w[kh, w_in - wo + p, ci, co] (0 outside band),
    so one output row of the 'same'-padded conv is  sum_kh x_row[h + kh - p] @ B[kh].
    Horizontal padding is absorbed by the band; the vertical offset is applied by S.
    """
    K, _, Cin, Cout = w.shape
    p = K // 2
    w_in = jnp.arange(W)[:, None]
    wo = jnp.arange(W)[None, :]
    kw = w_in - wo + p
    valid = (kw >= 0) & (kw < K)
    g = w[:, jnp.clip(kw, 0, K - 1)]                    # (K, W_in, W_out, Cin, Cout)
    g = jnp.where(valid[None, :, :, None, None], g, 0.0)
    g = jnp.transpose(g, (0, 1, 3, 2, 4))               # (K, W_in, Cin, W_out, Cout)
    return g.reshape(K, W * Cin, W * Cout)


def _build_pool_selectors(W, C):
    """Selection matrices for the horizontal 2x pool: (W*C, Wo*C) each, channel-diagonal."""
    Wo = W // 2
    w_idx = jnp.arange(W)[:, None]
    wo_idx = jnp.arange(Wo)[None, :]
    eye = jnp.eye(C, dtype=jnp.float32)
    even = (w_idx == 2 * wo_idx).astype(jnp.float32)[:, None, :, None] * eye[None, :, None, :]
    odd = (w_idx == 2 * wo_idx + 1).astype(jnp.float32)[:, None, :, None] * eye[None, :, None, :]
    return even.reshape(W * C, Wo * C), odd.reshape(W * C, Wo * C)


def _build_shift_ops(b_tile, H, K):
    """Block-diagonal row-shift operators S (K, M, M), M = b_tile*H.

    S[kh][i, j] = 1  iff  j == i + (kh - p)  and rows i, j belong to the same image.
    Applying S[kh] to the band-matmul result gives the kh term of the vertically
    'same'-padded conv (rows outside the image contribute zero).
    """
    M = b_tile * H
    p = K // 2
    i = np.arange(M)[:, None]
    j = np.arange(M)[None, :]
    mats = []
    for kh in range(K):
        d = kh - p
        ok = (j == i + d) & (i // H == j // H)
        mats.append(ok.astype(np.float32))
    return jnp.asarray(np.stack(mats))


def _pick_batch_tile(N, H, max_rows=256):
    """Largest batch tile with B_TILE*H <= max_rows rows per matmul."""
    bt = max(1, min(N, max(1, max_rows // H)))
    if (bt * H) % 8 != 0 and bt != N:
        bt = N          # block == full array: no (8,.) divisibility constraint
    return bt


def prepare_basic_block(params, x_shape, kernel, enable_residual, max_rows=256):
    """Build all grid-invariant kernel constants ONCE (inference-time constants)."""
    N, Cin, H, W = x_shape
    K = kernel
    Cout = params["w1"].shape[-1]
    assert K % 2 == 1, "band/padding math assumes odd kernel with 'same' padding"
    assert H % 2 == 0 and W % 2 == 0, "MaxPool2d(2,2) path assumes even H, W"
    if enable_residual:
        assert Cin == Cout, "residual add requires inch == outch"

    b_tile = _pick_batch_tile(N, H, max_rows)

    w1f, bias1 = _fold_bn_into_conv(params["w1"], params["gamma1"], params["beta1"],
                                    params["mean1"], params["var1"])
    w2f, bias2 = _fold_bn_into_conv(params["w2"], params["gamma2"], params["beta2"],
                                    params["mean2"], params["var2"])
    Se, So = _build_pool_selectors(W, Cout)

    consts = {
        "B1": _build_row_band(w1f, W).astype(jnp.bfloat16),      # (K, W*Cin,  W*Cout)
        "B2": _build_row_band(w2f, W).astype(jnp.bfloat16),      # (K, W*Cout, W*Cout)
        "bias1": jnp.tile(bias1, W).reshape(1, W * Cout).astype(jnp.float32),
        "bias2": jnp.tile(bias2, W).reshape(1, W * Cout).astype(jnp.float32),
        "S": _build_shift_ops(b_tile, H, K),                     # (K, M, M) f32
        "Se": Se, "So": So,                                      # (W*Cout, Wo*Cout) f32
    }
    if enable_residual:
        Se_in, So_in = _build_pool_selectors(W, Cin)
        consts["Savg"] = 0.25 * (Se_in + So_in)                  # (W*Cin, Wo*Cin) f32
    return consts


# ------------------------------ public forward ------------------------------ #

@functools.partial(jax.jit, static_argnames=("kernel", "enable_residual"))
def basic_block_forward(x_nchw, consts, kernel, enable_residual):
    """Forward pass of BasicBlock. Input/output NCHW (f32 in, f32 out)."""
    N, Cin, H, W = x_nchw.shape
    K = kernel
    WC_out = consts["B1"].shape[2]
    Cout = WC_out // W
    M = consts["S"].shape[1]
    B_TILE = M // H
    Ho, Wo = H // 2, W // 2
    Mo = M // 2
    G = -(-N // B_TILE)
    N_pad = G * B_TILE

    # NCHW -> row-flattened NHWC, stacked batch rows, bf16 operands for the MXU.
    xt = jnp.transpose(x_nchw, (0, 2, 3, 1)).astype(jnp.bfloat16)     # (N, H, W, Cin)
    if N_pad != N:
        xt = jnp.pad(xt, ((0, N_pad - N), (0, 0), (0, 0), (0, 0)))
    x2d = xt.reshape(N_pad * H, W * Cin)

    in_specs = [
        pl.BlockSpec((M, W * Cin), lambda i: (i, 0)),
        pl.BlockSpec((K, M, M), lambda i: (0, 0, 0)),
        pl.BlockSpec((K, W * Cin, WC_out), lambda i: (0, 0, 0)),
        pl.BlockSpec((1, WC_out), lambda i: (0, 0)),
        pl.BlockSpec((K, WC_out, WC_out), lambda i: (0, 0, 0)),
        pl.BlockSpec((1, WC_out), lambda i: (0, 0)),
        pl.BlockSpec((WC_out, Wo * Cout), lambda i: (0, 0)),
        pl.BlockSpec((WC_out, Wo * Cout), lambda i: (0, 0)),
    ]
    args = [x2d, consts["S"], consts["B1"], consts["bias1"],
            consts["B2"], consts["bias2"], consts["Se"], consts["So"]]
    if enable_residual:
        in_specs.append(pl.BlockSpec((W * Cin, Wo * Cin), lambda i: (0, 0)))
        args.append(consts["Savg"])

    kern = functools.partial(_basic_block_kernel, enable_residual=enable_residual)
    out2d = pl.pallas_call(
        kern,
        out_shape=jax.ShapeDtypeStruct((N_pad * Ho, Wo * Cout), jnp.float32),
        grid=(G,),
        in_specs=in_specs,
        out_specs=pl.BlockSpec((Mo, Wo * Cout), lambda i: (i, 0)),
        scratch_shapes=[pltpu.VMEM((M, WC_out), jnp.float32)],
        compiler_params=pltpu.CompilerParams(
            dimension_semantics=("parallel",),
            vmem_limit_bytes=32 * 1024 * 1024,
        ),
    )(*args)

    out = out2d.reshape(N_pad, Ho, Wo, Cout)[:N]        # drop batch padding
    return jnp.transpose(out, (0, 3, 1, 2))             # NHWC -> NCHW


# ----------------------- deterministic parameter init ----------------------- #

def init_basic_block_params(key, inch, outch, kernel):
    ks = jax.random.split(key, 10)

    def conv_w(k, cin, cout):
        fan_in = cin * kernel * kernel
        return jax.random.normal(k, (kernel, kernel, cin, cout), jnp.float32) / np.sqrt(fan_in)

    return {
        "w1": conv_w(ks[0], inch, outch),
        "gamma1": 1.0 + 0.1 * jax.random.normal(ks[1], (outch,), jnp.float32),
        "beta1": 0.1 * jax.random.normal(ks[2], (outch,), jnp.float32),
        "mean1": 0.1 * jax.random.normal(ks[3], (outch,), jnp.float32),
        "var1": 0.5 + jnp.abs(jax.random.normal(ks[4], (outch,), jnp.float32)),
        "w2": conv_w(ks[5], outch, outch),
        "gamma2": 1.0 + 0.1 * jax.random.normal(ks[6], (outch,), jnp.float32),
        "beta2": 0.1 * jax.random.normal(ks[7], (outch,), jnp.float32),
        "mean2": 0.1 * jax.random.normal(ks[8], (outch,), jnp.float32),
        "var2": 0.5 + jnp.abs(jax.random.normal(ks[9], (outch,), jnp.float32)),
    }


# ----------------------------- pure-JAX reference --------------------------- #

def reference_forward(x_nchw, params, kernel, enable_residual):
    x = jnp.transpose(x_nchw, (0, 2, 3, 1)).astype(jnp.float32)

    def cbr(z, w, g, b, m, v):
        y = jax.lax.conv_general_dilated(
            z, w, window_strides=(1, 1), padding="SAME",
            dimension_numbers=("NHWC", "HWIO", "NHWC"))
        scale = g / jnp.sqrt(v + 1e-5)
        return jnp.maximum(y * scale + (b - m * scale), 0.0)

    y = cbr(x, params["w1"], params["gamma1"], params["beta1"], params["mean1"], params["var1"])
    y = cbr(y, params["w2"], params["gamma2"], params["beta2"], params["mean2"], params["var2"])

    N, H, W, C = y.shape
    out = y.reshape(N, H // 2, 2, W // 2, 2, C).max(axis=(2, 4))
    if enable_residual:
        out = out + x.reshape(N, H // 2, 2, W // 2, 2, C).mean(axis=(2, 4))
    return jnp.transpose(out, (0, 3, 1, 2))


# ------------------------------------ main ---------------------------------- #

if __name__ == "__main__":
    key = jax.random.PRNGKey(0)
    kx1, kp1, kx2, kp2 = jax.random.split(key, 4)
    K = 3
    # Loose tolerances because conv operands are bf16 (MXU-native); accumulation is f32.
    TOL = dict(rtol=1e-1, atol=1e-1)

    # Case 1: enable_residual=True (requires inch == outch)
    inch = outch = 8
    x1 = jax.random.normal(kx1, (2, inch, 16, 16), jnp.float32)
    p1 = init_basic_block_params(kp1, inch, outch, K)
    c1 = prepare_basic_block(p1, x1.shape, kernel=K, enable_residual=True)
    out1 = jax.block_until_ready(basic_block_forward(x1, c1, kernel=K, enable_residual=True))
    ref1 = reference_forward(x1, p1, kernel=K, enable_residual=True)
    assert out1.shape == (2, outch, 8, 8), out1.shape
    assert np.allclose(np.asarray(out1), np.asarray(ref1), **TOL), \
        float(np.max(np.abs(np.asarray(out1) - np.asarray(ref1))))

    # Case 2: enable_residual=False, inch != outch
    inch2, outch2 = 4, 8
    x2 = jax.random.normal(kx2, (2, inch2, 16, 16), jnp.float32)
    p2 = init_basic_block_params(kp2, inch2, outch2, K)
    c2 = prepare_basic_block(p2, x2.shape, kernel=K, enable_residual=False)
    out2 = jax.block_until_ready(basic_block_forward(x2, c2, kernel=K, enable_residual=False))
    ref2 = reference_forward(x2, p2, kernel=K, enable_residual=False)
    assert out2.shape == (2, outch2, 8, 8), out2.shape
    assert np.allclose(np.asarray(out2), np.asarray(ref2), **TOL), \
        float(np.max(np.abs(np.asarray(out2) - np.asarray(ref2))))

    print("KERNEL_OK")
</pallas_src>

<mosaic_0001>
module attributes {stable_mosaic.version = 11 : i64} {
  func.func @_basic_block_kernel(%arg0: i32, %arg1: memref<32x128xbf16, #tpu.memory_space<vmem>>, %arg2: memref<3x32x32xf32, #tpu.memory_space<vmem>>, %arg3: memref<3x128x128xbf16, #tpu.memory_space<vmem>>, %arg4: memref<1x128xf32, #tpu.memory_space<vmem>>, %arg5: memref<3x128x128xbf16, #tpu.memory_space<vmem>>, %arg6: memref<1x128xf32, #tpu.memory_space<vmem>>, %arg7: memref<128x64xf32, #tpu.memory_space<vmem>>, %arg8: memref<128x64xf32, #tpu.memory_space<vmem>>, %arg9: memref<128x64xf32, #tpu.memory_space<vmem>>, %arg10: memref<16x64xf32, #tpu.memory_space<vmem>>, %arg11: memref<32x128xf32, #tpu.memory_space<vmem>>) attributes {dimension_semantics = [#tpu.dimension_semantics<parallel>], iteration_bounds = array<i64: 1>, scalar_prefetch = 0 : i64, scratch_operands = 1 : i64, tpu.core_type = #tpu.core_type<tc>, window_params = [{transform_indices = @transform_0, window_bounds = array<i64: 32, 128>}, {pipeline_mode = #tpu.pipeline_mode<synchronous>, transform_indices = @transform_1, window_bounds = array<i64: 3, 32, 32>}, {pipeline_mode = #tpu.pipeline_mode<synchronous>, transform_indices = @transform_2, window_bounds = array<i64: 3, 128, 128>}, {pipeline_mode = #tpu.pipeline_mode<synchronous>, transform_indices = @transform_3, window_bounds = array<i64: 1, 128>}, {pipeline_mode = #tpu.pipeline_mode<synchronous>, transform_indices = @transform_4, window_bounds = array<i64: 3, 128, 128>}, {pipeline_mode = #tpu.pipeline_mode<synchronous>, transform_indices = @transform_5, window_bounds = array<i64: 1, 128>}, {pipeline_mode = #tpu.pipeline_mode<synchronous>, transform_indices = @transform_6, window_bounds = array<i64: 128, 64>}, {pipeline_mode = #tpu.pipeline_mode<synchronous>, transform_indices = @transform_7, window_bounds = array<i64: 128, 64>}, {pipeline_mode = #tpu.pipeline_mode<synchronous>, transform_indices = @transform_8, window_bounds = array<i64: 128, 64>}, {transform_indices = @transform_9, window_bounds = array<i64: 16, 64>}]} {
    %c0 = arith.constant 0 : index
    %c0_0 = arith.constant 0 : index
    %0 = vector.load %arg1[%c0, %c0_0] : memref<32x128xbf16, #tpu.memory_space<vmem>>, vector<32x128xbf16>
    %c0_1 = arith.constant 0 : index
    %c0_2 = arith.constant 0 : index
    %c0_3 = arith.constant 0 : index
    %1 = vector.load %arg3[%c0_1, %c0_2, %c0_3] : memref<3x128x128xbf16, #tpu.memory_space<vmem>>, vector<1x128x128xbf16>
    %2 = vector.shape_cast %1 : vector<1x128x128xbf16> to vector<128x128xbf16>
    %cst = arith.constant dense<0.000000e+00> : vector<32x128xf32>
    %3 = tpu.matmul %0, %2, %cst {dimension_numbers = #tpu.dot_dimension_numbers<[1], [0], [0], [1], [0, 0, 1, 1], [], []>} : vector<32x128xbf16>, vector<128x128xbf16>, vector<32x128xf32> -> vector<32x128xf32>
    %c0_4 = arith.constant 0 : index
    %c0_5 = arith.constant 0 : index
    %c0_6 = arith.constant 0 : index
    %4 = vector.load %arg2[%c0_4, %c0_5, %c0_6] : memref<3x32x32xf32, #tpu.memory_space<vmem>>, vector<1x32x32xf32>
    %5 = vector.shape_cast %4 : vector<1x32x32xf32> to vector<32x32xf32>
    %cst_7 = arith.constant dense<0.000000e+00> : vector<32x128xf32>
    %6 = tpu.matmul %5, %3, %cst_7 {dimension_numbers = #tpu.dot_dimension_numbers<[1], [0], [0], [1], [0, 0, 1, 1], [], []>} : vector<32x32xf32>, vector<32x128xf32>, vector<32x128xf32> -> vector<32x128xf32>
    %c0_8 = arith.constant 0 : index
    %c0_9 = arith.constant 0 : index
    %7 = vector.load %arg11[%c0_8, %c0_9] : memref<32x128xf32, #tpu.memory_space<vmem>>, vector<32x128xf32>
    tpu.vector_store %arg11[%c0_8, %c0_9], %6 {strides = array<i32>} : memref<32x128xf32, #tpu.memory_space<vmem>>, vector<32x128xf32>,
    %c1 = arith.constant 1 : index
    %c0_10 = arith.constant 0 : index
    %c0_11 = arith.constant 0 : index
    %8 = vector.load %arg3[%c1, %c0_10, %c0_11] : memref<3x128x128xbf16, #tpu.memory_space<vmem>>, vector<1x128x128xbf16>
    %9 = vector.shape_cast %8 : vector<1x128x128xbf16> to vector<128x128xbf16>
    %cst_12 = arith.constant dense<0.000000e+00> : vector<32x128xf32>
    %10 = tpu.matmul %0, %9, %cst_12 {dimension_numbers = #tpu.dot_dimension_numbers<[1], [0], [0], [1], [0, 0, 1, 1], [], []>} : vector<32x128xbf16>, vector<128x128xbf16>, vector<32x128xf32> -> vector<32x128xf32>
    %c0_13 = arith.constant 0 : index
    %c0_14 = arith.constant 0 : index
    %11 = vector.load %arg11[%c0_13, %c0_14] : memref<32x128xf32, #tpu.memory_space<vmem>>, vector<32x128xf32>
    %12 = arith.addf %11, %10 : vector<32x128xf32>
    %c0_15 = arith.constant 0 : index
    %c0_16 = arith.constant 0 : index
    %13 = vector.load %arg11[%c0_15, %c0_16] : memref<32x128xf32, #tpu.memory_space<vmem>>, vector<32x128xf32>
    tpu.vector_store %arg11[%c0_15, %c0_16], %12 {strides = array<i32>} : memref<32x128xf32, #tpu.memory_space<vmem>>, vector<32x128xf32>,
    %c2 = arith.constant 2 : index
    %c0_17 = arith.constant 0 : index
    %c0_18 = arith.constant 0 : index
    %14 = vector.load %arg3[%c2, %c0_17, %c0_18] : memref<3x128x128xbf16, #tpu.memory_space<vmem>>, vector<1x128x128xbf16>
    %15 = vector.shape_cast %14 : vector<1x128x128xbf16> to vector<128x128xbf16>
    %cst_19 = arith.constant dense<0.000000e+00> : vector<32x128xf32>
    %16 = tpu.matmul %0, %15, %cst_19 {dimension_numbers = #tpu.dot_dimension_numbers<[1], [0], [0], [1], [0, 0, 1, 1], [], []>} : vector<32x128xbf16>, vector<128x128xbf16>, vector<32x128xf32> -> vector<32x128xf32>
    %c2_20 = arith.constant 2 : index
    %c0_21 = arith.constant 0 : index
    %c0_22 = arith.constant 0 : index
    %17 = vector.load %arg2[%c2_20, %c0_21, %c0_22] : memref<3x32x32xf32, #tpu.memory_space<vmem>>, vector<1x32x32xf32>
    %18 = vector.shape_cast %17 : vector<1x32x32xf32> to vector<32x32xf32>
    %cst_23 = arith.constant dense<0.000000e+00> : vector<32x128xf32>
    %19 = tpu.matmul %18, %16, %cst_23 {dimension_numbers = #tpu.dot_dimension_numbers<[1], [0], [0], [1], [0, 0, 1, 1], [], []>} : vector<32x32xf32>, vector<32x128xf32>, vector<32x128xf32> -> vector<32x128xf32>
    %c0_24 = arith.constant 0 : index
    %c0_25 = arith.constant 0 : index
    %20 = vector.load %arg11[%c0_24, %c0_25] : memref<32x128xf32, #tpu.memory_space<vmem>>, vector<32x128xf32>
    %21 = arith.addf %20, %19 : vector<32x128xf32>
    %c0_26 = arith.constant 0 : index
    %c0_27 = arith.constant 0 : index
    %22 = vector.load %arg11[%c0_26, %c0_27] : memref<32x128xf32, #tpu.memory_space<vmem>>, vector<32x128xf32>
    tpu.vector_store %arg11[%c0_26, %c0_27], %21 {strides = array<i32>} : memref<32x128xf32, #tpu.memory_space<vmem>>, vector<32x128xf32>,
    %c0_28 = arith.constant 0 : index
    %c0_29 = arith.constant 0 : index
    %23 = vector.load %arg11[%c0_28, %c0_29] : memref<32x128xf32, #tpu.memory_space<vmem>>, vector<32x128xf32>
    %c0_30 = arith.constant 0 : index
    %c0_31 = arith.constant 0 : index
    %24 = vector.load %arg4[%c0_30, %c0_31] : memref<1x128xf32, #tpu.memory_space<vmem>>, vector<1x128xf32>
    %25 = vector.broadcast %24 : vector<1x128xf32> to vector<32x128xf32>
    %26 = arith.addf %23, %25 : vector<32x128xf32>
    %cst_32 = arith.constant 0.000000e+00 : f32
    %27 = vector.broadcast %cst_32 : f32 to vector<32x128xf32>
    %28 = arith.maximumf %26, %27 : vector<32x128xf32>
    %29 = arith.truncf %28 : vector<32x128xf32> to vector<32x128xbf16>
    %c0_33 = arith.constant 0 : index
    %c0_34 = arith.constant 0 : index
    %c0_35 = arith.constant 0 : index
    %30 = vector.load %arg5[%c0_33, %c0_34, %c0_35] : memref<3x128x128xbf16, #tpu.memory_space<vmem>>, vector<1x128x128xbf16>
    %31 = vector.shape_cast %30 : vector<1x128x128xbf16> to vector<128x128xbf16>
    %cst_36 = arith.constant dense<0.000000e+00> : vector<32x128xf32>
    %32 = tpu.matmul %29, %31, %cst_36 {dimension_numbers = #tpu.dot_dimension_numbers<[1], [0], [0], [1], [0, 0, 1, 1], [], []>} : vector<32x128xbf16>, vector<128x128xbf16>, vector<32x128xf32> -> vector<32x128xf32>
    %c0_37 = arith.constant 0 : index
    %c0_38 = arith.constant 0 : index
    %c0_39 = arith.constant 0 : index
    %33 = vector.load %arg2[%c0_37, %c0_38, %c0_39] : memref<3x32x32xf32, #tpu.memory_space<vmem>>, vector<1x32x32xf32>
    %34 = vector.shape_cast %33 : vector<1x32x32xf32> to vector<32x32xf32>
    %cst_40 = arith.constant dense<0.000000e+00> : vector<32x128xf32>
    %35 = tpu.matmul %34, %32, %cst_40 {dimension_numbers = #tpu.dot_dimension_numbers<[1], [0], [0], [1], [0, 0, 1, 1], [], []>} : vector<32x32xf32>, vector<32x128xf32>, vector<32x128xf32> -> vector<32x128xf32>
    %c0_41 = arith.constant 0 : index
    %c0_42 = arith.constant 0 : index
    %36 = vector.load %arg11[%c0_41, %c0_42] : memref<32x128xf32, #tpu.memory_space<vmem>>, vector<32x128xf32>
    tpu.vector_store %arg11[%c0_41, %c0_42], %35 {strides = array<i32>} : memref<32x128xf32, #tpu.memory_space<vmem>>, vector<32x128xf32>,
    %c1_43 = arith.constant 1 : index
    %c0_44 = arith.constant 0 : index
    %c0_45 = arith.constant 0 : index
    %37 = vector.load %arg5[%c1_43, %c0_44, %c0_45] : memref<3x128x128xbf16, #tpu.memory_space<vmem>>, vector<1x128x128xbf16>
    %38 = vector.shape_cast %37 : vector<1x128x128xbf16> to vector<128x128xbf16>
    %cst_46 = arith.constant dense<0.000000e+00> : vector<32x128xf32>
    %39 = tpu.matmul %29, %38, %cst_46 {dimension_numbers = #tpu.dot_dimension_numbers<[1], [0], [0], [1], [0, 0, 1, 1], [], []>} : vector<32x128xbf16>, vector<128x128xbf16>, vector<32x128xf32> -> vector<32x128xf32>
    %c0_47 = arith.constant 0 : index
    %c0_48 = arith.constant 0 : index
    %40 = vector.load %arg11[%c0_47, %c0_48] : memref<32x128xf32, #tpu.memory_space<vmem>>, vector<32x128xf32>
    %41 = arith.addf %40, %39 : vector<32x128xf32>
    %c0_49 = arith.constant 0 : index
    %c0_50 = arith.constant 0 : index
    %42 = vector.load %arg11[%c0_49, %c0_50] : memref<32x128xf32, #tpu.memory_space<vmem>>, vector<32x128xf32>
    tpu.vector_store %arg11[%c0_49, %c0_50], %41 {strides = array<i32>} : memref<32x128xf32, #tpu.memory_space<vmem>>, vector<32x128xf32>,
    %c2_51 = arith.constant 2 : index
    %c0_52 = arith.constant 0 : index
    %c0_53 = arith.constant 0 : index
    %43 = vector.load %arg5[%c2_51, %c0_52, %c0_53] : memref<3x128x128xbf16, #tpu.memory_space<vmem>>, vector<1x128x128xbf16>
    %44 = vector.shape_cast %43 : vector<1x128x128xbf16> to vector<128x128xbf16>
    %cst_54 = arith.constant dense<0.000000e+00> : vector<32x128xf32>
    %45 = tpu.matmul %29, %44, %cst_54 {dimension_numbers = #tpu.dot_dimension_numbers<[1], [0], [0], [1], [0, 0, 1, 1], [], []>} : vector<32x128xbf16>, vector<128x128xbf16>, vector<32x128xf32> -> vector<32x128xf32>
    %c2_55 = arith.constant 2 : index
    %c0_56 = arith.constant 0 : index
    %c0_57 = arith.constant 0 : index
    %46 = vector.load %arg2[%c2_55, %c0_56, %c0_57] : memref<3x32x32xf32, #tpu.memory_space<vmem>>, vector<1x32x32xf32>
    %47 = vector.shape_cast %46 : vector<1x32x32xf32> to vector<32x32xf32>
    %cst_58 = arith.constant dense<0.000000e+00> : vector<32x128xf32>
    %48 = tpu.matmul %47, %45, %cst_58 {dimension_numbers = #tpu.dot_dimension_numbers<[1], [0], [0], [1], [0, 0, 1, 1], [], []>} : vector<32x32xf32>, vector<32x128xf32>, vector<32x128xf32> -> vector<32x128xf32>
    %c0_59 = arith.constant 0 : index
    %c0_60 = arith.constant 0 : index
    %49 = vector.load %arg11[%c0_59, %c0_60] : memref<32x128xf32, #tpu.memory_space<vmem>>, vector<32x128xf32>
    %50 = arith.addf %49, %48 : vector<32x128xf32>
    %c0_61 = arith.constant 0 : index
    %c0_62 = arith.constant 0 : index
    %51 = vector.load %arg11[%c0_61, %c0_62] : memref<32x128xf32, #tpu.memory_space<vmem>>, vector<32x128xf32>
    tpu.vector_store %arg11[%c0_61, %c0_62], %50 {strides = array<i32>} : memref<32x128xf32, #tpu.memory_space<vmem>>, vector<32x128xf32>,
    %c0_63 = arith.constant 0 : index
    %c0_64 = arith.constant 0 : index
    %52 = vector.load %arg11[%c0_63, %c0_64] : memref<32x128xf32, #tpu.memory_space<vmem>>, vector<32x128xf32>
    %c0_65 = arith.constant 0 : index
    %c0_66 = arith.constant 0 : index
    %53 = vector.load %arg6[%c0_65, %c0_66] : memref<1x128xf32, #tpu.memory_space<vmem>>, vector<1x128xf32>
    %54 = vector.broadcast %53 : vector<1x128xf32> to vector<32x128xf32>
    %55 = arith.addf %52, %54 : vector<32x128xf32>
    %cst_67 = arith.constant 0.000000e+00 : f32
    %56 = vector.broadcast %cst_67 : f32 to vector<32x128xf32>
    %57 = arith.maximumf %55, %56 : vector<32x128xf32>
    %58 = vector.shape_cast %57 : vector<32x128xf32> to vector<16x2x128xf32>
    %59 = vector.extract_strided_slice %58 {offsets = [0, 0, 0], sizes = [16, 1, 128], strides = [1, 1, 1]} : vector<16x2x128xf32> to vector<16x1x128xf32>
    %60 = vector.shape_cast %59 : vector<16x1x128xf32> to vector<16x128xf32>
    %61 = vector.extract_strided_slice %58 {offsets = [0, 1, 0], sizes = [16, 1, 128], strides = [1, 1, 1]} : vector<16x2x128xf32> to vector<16x1x128xf32>
    %62 = vector.shape_cast %61 : vector<16x1x128xf32> to vector<16x128xf32>
    %63 = arith.maximumf %60, %62 : vector<16x128xf32>
    %c0_68 = arith.constant 0 : index
    %c0_69 = arith.constant 0 : index
    %64 = vector.load %arg7[%c0_68, %c0_69] : memref<128x64xf32, #tpu.memory_space<vmem>>, vector<128x64xf32>
    %cst_70 = arith.constant dense<0.000000e+00> : vector<16x64xf32>
    %65 = tpu.matmul %63, %64, %cst_70 {dimension_numbers = #tpu.dot_dimension_numbers<[1], [0], [0], [1], [0, 0, 1, 1], [], []>} : vector<16x128xf32>, vector<128x64xf32>, vector<16x64xf32> -> vector<16x64xf32>
    %c0_71 = arith.constant 0 : index
    %c0_72 = arith.constant 0 : index
    %66 = vector.load %arg8[%c0_71, %c0_72] : memref<128x64xf32, #tpu.memory_space<vmem>>, vector<128x64xf32>
    %cst_73 = arith.constant dense<0.000000e+00> : vector<16x64xf32>
    %67 = tpu.matmul %63, %66, %cst_73 {dimension_numbers = #tpu.dot_dimension_numbers<[1], [0], [0], [1], [0, 0, 1, 1], [], []>} : vector<16x128xf32>, vector<128x64xf32>, vector<16x64xf32> -> vector<16x64xf32>
    %68 = arith.maximumf %65, %67 : vector<16x64xf32>
    %69 = arith.extf %0 : vector<32x128xbf16> to vector<32x128xf32>
    %70 = vector.shape_cast %69 : vector<32x128xf32> to vector<16x2x128xf32>
    %71 = vector.extract_strided_slice %70 {offsets = [0, 0, 0], sizes = [16, 1, 128], strides = [1, 1, 1]} : vector<16x2x128xf32> to vector<16x1x128xf32>
    %72 = vector.shape_cast %71 : vector<16x1x128xf32> to vector<16x128xf32>
    %73 = vector.extract_strided_slice %70 {offsets = [0, 1, 0], sizes = [16, 1, 128], strides = [1, 1, 1]} : vector<16x2x128xf32> to vector<16x1x128xf32>
    %74 = vector.shape_cast %73 : vector<16x1x128xf32> to vector<16x128xf32>
    %75 = arith.addf %72, %74 : vector<16x128xf32>
    %c0_74 = arith.constant 0 : index
    %c0_75 = arith.constant 0 : index
    %76 = vector.load %arg9[%c0_74, %c0_75] : memref<128x64xf32, #tpu.memory_space<vmem>>, vector<128x64xf32>
    %cst_76 = arith.constant dense<0.000000e+00> : vector<16x64xf32>
    %77 = tpu.matmul %75, %76, %cst_76 {dimension_numbers = #tpu.dot_dimension_numbers<[1], [0], [0], [1], [0, 0, 1, 1], [], []>} : vector<16x128xf32>, vector<128x64xf32>, vector<16x64xf32> -> vector<16x64xf32>
    %78 = arith.addf %68, %77 : vector<16x64xf32>
    %c0_77 = arith.constant 0 : index
    %c0_78 = arith.constant 0 : index
    %79 = vector.load %arg10[%c0_77, %c0_78] : memref<16x64xf32, #tpu.memory_space<vmem>>, vector<16x64xf32>
    tpu.vector_store %arg10[%c0_77, %c0_78], %78 {strides = array<i32>} : memref<16x64xf32, #tpu.memory_space<vmem>>, vector<16x64xf32>,
    return
  }
  func.func @transform_0(%arg0: i32) -> (i32, i32) {
    %c0_i32 = arith.constant 0 : i32
    %c0_i32_0 = arith.constant 0 : i32
    return %arg0, %c0_i32 : i32, i32
  }
  func.func @transform_1(%arg0: i32) -> (i32, i32, i32) {
    %c0_i32 = arith.constant 0 : i32
    %c0_i32_0 = arith.constant 0 : i32
    %c0_i32_1 = arith.constant 0 : i32
    %c0_i32_2 = arith.constant 0 : i32
    return %c0_i32, %c0_i32_0, %c0_i32_1 : i32, i32, i32
  }
  func.func @transform_2(%arg0: i32) -> (i32, i32, i32) {
    %c0_i32 = arith.constant 0 : i32
    %c0_i32_0 = arith.constant 0 : i32
    %c0_i32_1 = arith.constant 0 : i32
    %c0_i32_2 = arith.constant 0 : i32
    return %c0_i32, %c0_i32_0, %c0_i32_1 : i32, i32, i32
  }
  func.func @transform_3(%arg0: i32) -> (i32, i32) {
    %c0_i32 = arith.constant 0 : i32
    %c0_i32_0 = arith.constant 0 : i32
    %c0_i32_1 = arith.constant 0 : i32
    return %c0_i32, %c0_i32_0 : i32, i32
  }
  func.func @transform_4(%arg0: i32) -> (i32, i32, i32) {
    %c0_i32 = arith.constant 0 : i32
    %c0_i32_0 = arith.constant 0 : i32
    %c0_i32_1 = arith.constant 0 : i32
    %c0_i32_2 = arith.constant 0 : i32
    return %c0_i32, %c0_i32_0, %c0_i32_1 : i32, i32, i32
  }
  func.func @transform_5(%arg0: i32) -> (i32, i32) {
    %c0_i32 = arith.constant 0 : i32
    %c0_i32_0 = arith.constant 0 : i32
    %c0_i32_1 = arith.constant 0 : i32
    return %c0_i32, %c0_i32_0 : i32, i32
  }
  func.func @transform_6(%arg0: i32) -> (i32, i32) {
    %c0_i32 = arith.constant 0 : i32
    %c0_i32_0 = arith.constant 0 : i32
    %c0_i32_1 = arith.constant 0 : i32
    return %c0_i32, %c0_i32_0 : i32, i32
  }
  func.func @transform_7(%arg0: i32) -> (i32, i32) {
    %c0_i32 = arith.constant 0 : i32
    %c0_i32_0 = arith.constant 0 : i32
    %c0_i32_1 = arith.constant 0 : i32
    return %c0_i32, %c0_i32_0 : i32, i32
  }
  func.func @transform_8(%arg0: i32) -> (i32, i32) {
    %c0_i32 = arith.constant 0 : i32
    %c0_i32_0 = arith.constant 0 : i32
    %c0_i32_1 = arith.constant 0 : i32
    return %c0_i32, %c0_i32_0 : i32, i32
  }
  func.func @transform_9(%arg0: i32) -> (i32, i32) {
    %c0_i32 = arith.constant 0 : i32
    %c0_i32_0 = arith.constant 0 : i32
    return %arg0, %c0_i32 : i32, i32
  }
}

</mosaic_0001>

<bundles_post_ra>
// kernel: basic_block_forward.1
= control target key start
LH: loop header
LB: loop body
LE: loop exit
PB: predicated region body
PF: predicated region fallthrough
CT: control target
= control target key end

     0   :  { %vm166_vm0 = vcmask 261120   ;;  %vm1481_vm1 = vcmask 1041409   ;;  %vm1483_vm2 = vcmask 1042434   ;;  %vm1485_vm3 = vcmask 1043459   ;;  %s3369_s2 = inlined_call_operand.vmem [shape: bf16[3,128,128], index: 2, kind: input, shape index: {}]   ;;  %s3370_s0 = inlined_call_operand.vmem [shape: bf16[32,128], index: 0, kind: input, shape index: {}]   ;;  %s3371_s1 = inlined_call_operand.vmem [shape: f32[3,32,32], index: 1, kind: input, shape index: {}]   ;;  %s3372_s4 = inlined_call_operand.vmem [shape: bf16[3,128,128], index: 4, kind: input, shape index: {}]   ;;  %s3373_s3 = inlined_call_operand.vmem [shape: f32[1,128], index: 3, kind: input, shape index: {}]   ;;  %s3374_s6 = inlined_call_operand.vmem [shape: f32[128,64], index: 6, kind: input, shape index: {}]   ;;  %s3375_s7 = inlined_call_operand.vmem [shape: f32[128,64], index: 7, kind: input, shape index: {}]   ;;  %s3376_s8 = inlined_call_operand.vmem [shape: f32[128,64], index: 8, kind: input, shape index: {}]   ;;  %s3377_s5 = inlined_call_operand.vmem [shape: f32[1,128], index: 5, kind: input, shape index: {}]   ;;  %s3378_s9 = inlined_call_operand.vmem [shape: f32[16,64], index: 9, kind: output, shape index: {}]  }
   0x1   :  { %v2752_v0 = vld [vmem:[%s3369_s2] sm:$0xff]   ;;  %v2753_v1 = vld [vmem:[%s3369_s2 + $0x8] sm:$0xff]   ;;  %v2754_v2 = vld [vmem:[%s3369_s2 + $0x10] sm:$0xff]   ;;  %vm1487_vm4 = vcmask 1044484   ;;  %vm1489_vm5 = vcmask 1045509   ;;  %vm1491_vm6 = vcmask 1046534  }
   0x2   :  { %2342 = vmatprep.subr.bf16.mxu0 %v2752_v0  ;;  %v2755_v3 = vld [vmem:[%s3369_s2 + $0x18] sm:$0xff]   ;;  %v2871_v4 = vld [vmem:[%s3370_s0] sm:$0xff]   ;;  %v2757_v6 = vld [vmem:[%s3369_s2 + $0x28] sm:$0xff]   ;;  %vm1493_vm7 = vcmask 1047559   ;;  %vm2017_vm8 = vcmask 523264  }
   0x3   :  { %2343 = vmatpush3.bf16.msra.mxu0 %v2752_v0  ;;  %2358 = vmatprep.mubr.bf16.mxu0 %v2871_v4  ;;  %v2756_v5 = vld [vmem:[%s3369_s2 + $0x20] sm:$0xff]   ;;  %v2758_v7 = vld [vmem:[%s3369_s2 + $0x30] sm:$0xff]   ;;  %v2759_v8 = vld [vmem:[%s3369_s2 + $0x38] sm:$0xff]  }
   0x4   :  { %2344 = vmatprep.subr.bf16.mxu0 %v2753_v1  ;;  %v2889_v9 = vld [vmem:[%s3370_s0 + $0x8] sm:$0xff]   ;;  %v2762_v10 = vld [vmem:[%s3369_s2 + $0x80] sm:$0xff]   ;;  %v2764_v12 = vld [vmem:[%s3369_s2 + $0x90] sm:$0xff]  }
   0x5   :  { %v2763_v11 = vld [vmem:[%s3369_s2 + $0x88] sm:$0xff]   ;;  %v2765_v13 = vld [vmem:[%s3369_s2 + $0x98] sm:$0xff]   ;;  %v2766_v14 = vld [vmem:[%s3369_s2 + $0xa0] sm:$0xff]  }
   0x6   :  { %v2767_v15 = vld [vmem:[%s3369_s2 + $0xa8] sm:$0xff]   ;;  %v2768_v16 = vld [vmem:[%s3369_s2 + $0xb0] sm:$0xff]   ;;  %v2769_v17 = vld [vmem:[%s3369_s2 + $0xb8] sm:$0xff]  }
   0x7   :  { %2345 = vmatpush3.bf16.msra.mxu0 %v2753_v1  ;;  %v2921_v18 = vld [vmem:[%s3371_s1] sm:$0xff]  ;;  %v2931_v26 = vld [vmem:[%s3371_s1 + $0x8] sm:$0xff]  ;;  %v2939_v28 = vld [vmem:[%s3371_s1 + $0x10] sm:$0xff] }
   0x8   :  { %2346 = vmatprep.subr.bf16.mxu0 %v2754_v2  ;;  %2370 = vmatprep.mubr.msk.f32.mxu1 %vm166_vm0, %v2921_v18  ;;  %v2770_v25 = vld [vmem:[%s3369_s2 + $0x40] sm:$0xff]   ;;  %v2771_v27 = vld [vmem:[%s3369_s2 + $0x48] sm:$0xff]   ;;  %v2948_v29 = vld [vmem:[%s3371_s1 + $0x18] sm:$0xff] }
   0x9   :  { %v2772_v30 = vld [vmem:[%s3369_s2 + $0x50] sm:$0xff]   ;;  %v2773_v31 = vld [vmem:[%s3369_s2 + $0x58] sm:$0xff]   ;;  %v2774_v32 = vld [vmem:[%s3369_s2 + $0x60] sm:$0xff]  }
   0xa   :  { %v2775_v33 = vld [vmem:[%s3369_s2 + $0x68] sm:$0xff]   ;;  %v2776_v35 = vld [vmem:[%s3369_s2 + $0x70] sm:$0xff]   ;;  %v2777_v41 = vld [vmem:[%s3369_s2 + $0x78] sm:$0xff]  }
   0xb   :  { %2347 = vmatpush3.bf16.msra.mxu0 %v2754_v2  ;;  %v2974_v42 = vld [vmem:[%s3371_s1 + $0x40] sm:$0xff]  ;;  %v2982_v43 = vld [vmem:[%s3371_s1 + $0x48] sm:$0xff]  ;;  %v2987_v44 = vld [vmem:[%s3371_s1 + $0x50] sm:$0xff] }
   0xc   :  { %2348 = vmatprep.subr.bf16.mxu0 %v2755_v3  ;;  %v2996_v45 = vld [vmem:[%s3371_s1 + $0x58] sm:$0xff]  ;;  %v2778_v46 = vld [vmem:[%s3372_s4] sm:$0xff]   ;;  %v2780_v48 = vld [vmem:[%s3372_s4 + $0x8] sm:$0xff]  }
   0xd   :  { %v2779_v47 = vld [vmem:[%s3372_s4 + $0x40] sm:$0xff]   ;;  %v2781_v49 = vld [vmem:[%s3372_s4 + $0x48] sm:$0xff]   ;;  %v2782_v50 = vld [vmem:[%s3372_s4 + $0x10] sm:$0xff]  }
   0xe   :  { %v2783_v51 = vld [vmem:[%s3372_s4 + $0x50] sm:$0xff]   ;;  %v2784_v52 = vld [vmem:[%s3372_s4 + $0x18] sm:$0xff]   ;;  %v2786_v54 = vld [vmem:[%s3372_s4 + $0x20] sm:$0xff]  }
   0xf   :  { %2349 = vmatpush3.bf16.msra.mxu0 %v2755_v3  ;;  %v2785_v53 = vld [vmem:[%s3372_s4 + $0x58] sm:$0xff]   ;;  %v2787_v55 = vld [vmem:[%s3372_s4 + $0x60] sm:$0xff]   ;;  %v2788_v56 = vld [vmem:[%s3372_s4 + $0x28] sm:$0xff]  }
  0x10   :  { %2350 = vmatprep.subr.bf16.mxu0 %v2756_v5  ;;  %v2789_v57 = vld [vmem:[%s3372_s4 + $0x68] sm:$0xff]   ;;  %v2790_v58 = vld [vmem:[%s3372_s4 + $0x30] sm:$0xff]   ;;  %v2792_v60 = vld [vmem:[%s3372_s4 + $0x38] sm:$0xff]  }
  0x11   :  { %v2791_v59 = vld [vmem:[%s3372_s4 + $0x70] sm:$0xff]   ;;  %v2793_v61 = vld [vmem:[%s3372_s4 + $0x78] sm:$0xff]  }
  0x13   :  { %2351 = vmatpush3.bf16.msra.mxu0 %v2756_v5 }
  0x14   :  { %2352 = vmatprep.subr.bf16.mxu0 %v2757_v6 }
  0x17   :  { %2353 = vmatpush3.bf16.msra.mxu0 %v2757_v6 }
  0x18   :  { %2354 = vmatprep.subr.bf16.mxu0 %v2758_v7 }
  0x1b   :  { %2355 = vmatpush3.bf16.msra.mxu0 %v2758_v7 }
  0x1c   :  { %2356 = vmatprep.subr.bf16.mxu0 %v2759_v8 }
  0x1f   :  { %2357 = vmatpush3.bf16.msra.mxu0 %v2759_v8 }
  0x20   :  { %2396 = vmatprep.subr.bf16.mxu0 %v2762_v10 }
  0x22   :  { %2359 = vmatmul.mubr.bf16.vlgmr.msra.gmra.mrb[0].mxu0 %v2889_v9 }
  0x23   :  { %2397 = vmatpush3.bf16.msra.mxu0 %v2762_v10  ;;  %2412 = vmatprep.mubr.bf16.mxu0 %v2871_v4 }
  0x24   :  { %2398 = vmatprep.subr.bf16.mxu0 %v2763_v11 }
  0x27   :  { %2399 = vmatpush3.bf16.msra.mxu0 %v2763_v11 }
  0x28   :  { %2400 = vmatprep.subr.bf16.mxu0 %v2764_v12 }
  0x2b   :  { %2401 = vmatpush3.bf16.msra.mxu0 %v2764_v12 }
  0x2c   :  { %2402 = vmatprep.subr.bf16.mxu0 %v2765_v13 }
  0x2f   :  { %2403 = vmatpush3.bf16.msra.mxu0 %v2765_v13  ;;  %v2094_v13 = vld [vmem:[%s3373_s3] ss:$0 sm:$0xff] }
  0x30   :  { %2404 = vmatprep.subr.bf16.mxu0 %v2766_v14 }
  0x33   :  { %2405 = vmatpush3.bf16.msra.mxu0 %v2766_v14 }
  0x34   :  { %2406 = vmatprep.subr.bf16.mxu0 %v2767_v15 }
  0x37   :  { %2407 = vmatpush3.bf16.msra.mxu0 %v2767_v15 }
  0x38   :  { %2408 = vmatprep.subr.bf16.mxu0 %v2768_v16 }
  0x3b   :  { %2409 = vmatpush3.bf16.msra.mxu0 %v2768_v16 }
  0x3c   :  { %2410 = vmatprep.subr.bf16.mxu0 %v2769_v17 }
  0x3f   :  { %2411 = vmatpush3.bf16.msra.mxu0 %v2769_v17 }
  0x40   :  { %2464 = vmatprep.subr.bf16.mxu0 %v2779_v47 }
  0x42   :  { %2413 = vmatmul.mubr.bf16.vlgmr.msra.gmra.mrb[4].mxu0 %v2889_v9 }
  0x43   :  { %2465 = vmatpush3.bf16.msra.mxu0 %v2779_v47 }
  0x44   :  { %2466 = vmatprep.subr.bf16.mxu0 %v2781_v49 }
  0x47   :  { %2467 = vmatpush3.bf16.msra.mxu0 %v2781_v49  ;;  %v2794_v49 = vld [vmem:[%s3372_s4 + $0x80] sm:$0xff]  }
  0x48   :  { %2468 = vmatprep.subr.bf16.mxu0 %v2783_v51 }
  0x4b   :  { %2469 = vmatpush3.bf16.msra.mxu0 %v2783_v51  ;;  %v2797_v51 = vld [vmem:[%s3372_s4 + $0x98] sm:$0xff]  }
  0x4c   :  { %2470 = vmatprep.subr.bf16.mxu0 %v2785_v53 }
  0x4f   :  { %2471 = vmatpush3.bf16.msra.mxu0 %v2785_v53  ;;  %v1385_v53 = vld [vmem:[%s3374_s6] sm:$0xff] }
  0x50   :  { %2472 = vmatprep.subr.bf16.mxu0 %v2787_v55 }
  0x53   :  { %2473 = vmatpush3.bf16.msra.mxu0 %v2787_v55 }
  0x54   :  { %2474 = vmatprep.subr.bf16.mxu0 %v2789_v57 }
  0x57   :  { %2475 = vmatpush3.bf16.msra.mxu0 %v2789_v57 }
  0x58   :  { %2476 = vmatprep.subr.bf16.mxu0 %v2791_v59 }
  0x5b   :  { %2477 = vmatpush3.bf16.msra.mxu0 %v2791_v59 }
  0x5c   :  { %2478 = vmatprep.subr.bf16.mxu0 %v2793_v61 }
  0x5f   :  { %2479 = vmatpush3.bf16.msra.mxu0 %v2793_v61 }
  0xf5   :  { %v2360_v19 = vpop.f32.mrb[0].mxu0 }
  0xf6   :  { %v147_v20 = vpop.f32.mrb[1].mxu0 }
  0xf7   :  { %v2361_v21 = vpop.f32.mrb[2].mxu0 }
  0xf8   :  { %v2627_v22 = vpack.c.bf16 %v2361_v21, %v2360_v19  ;;  %v150_v23 = vpop.f32.mrb[3].mxu0 }
  0xf9   :  { %v2623_v24 = vpack.c.bf16 %v150_v23, %v147_v20 }
  0xfb   :  { %2624 = vmatprep.subr.bf16.mxu1 %v2623_v24 }
  0xfc   :  { %2626 = vmatpush3.bf16.msra.mxu1 %v2623_v24 }
  0xfd   :  { %2628 = vmatprep.subr.bf16.mxu1 %v2627_v22 }
 0x100   :  { %2630 = vmatpush3.bf16.msra.mxu1 %v2627_v22 }
 0x101   :  { %2376 = vmatprep.subr.bf16.mxu1 %v2770_v25 }
 0x103   :  { %2371 = vmatmul.mubr.msk.f32.vlgmr.msra.gmra.mrb[0].mxu1 %vm166_vm0, %v2931_v26 }
 0x104   :  { %2377 = vmatpush3.bf16.msra.mxu1 %v2770_v25  ;;  %2373 = vmatprep.mubr.msk.f32.mxu1 %vm166_vm0, %v2939_v28 }
 0x105   :  { %2378 = vmatprep.subr.bf16.mxu1 %v2771_v27 }
 0x107   :  { %2374 = vmatmul.mubr.msk.f32.gmra.mrb[2].mxu1 %vm166_vm0, %v2948_v29 }
 0x108   :  { %2379 = vmatpush3.bf16.msra.mxu1 %v2771_v27  ;;  %2392 = vmatprep.mubr.bf16.mxu1 %v2871_v4 }
 0x109   :  { %2380 = vmatprep.subr.bf16.mxu1 %v2772_v30 }
 0x10c   :  { %2381 = vmatpush3.bf16.msra.mxu1 %v2772_v30 }
 0x10d   :  { %2382 = vmatprep.subr.bf16.mxu1 %v2773_v31 }
 0x110   :  { %2383 = vmatpush3.bf16.msra.mxu1 %v2773_v31 }
 0x111   :  { %2384 = vmatprep.subr.bf16.mxu1 %v2774_v32 }
 0x114   :  { %2385 = vmatpush3.bf16.msra.mxu1 %v2774_v32 }
 0x115   :  { %2386 = vmatprep.subr.bf16.mxu1 %v2775_v33  ;;  %v2414_v34 = vpop.f32.mrb[4].mxu0 }
 0x116   :  { %v493_v36 = vpop.f32.mrb[5].mxu0 }
 0x117   :  { %v2415_v37 = vpop.f32.mrb[6].mxu0 }
 0x118   :  { %2387 = vmatpush3.bf16.msra.mxu1 %v2775_v33  ;;  %v2635_v38 = vpack.c.bf16 %v2415_v37, %v2414_v34  ;;  %v496_v39 = vpop.f32.mrb[7].mxu0 }
 0x119   :  { %2388 = vmatprep.subr.bf16.mxu1 %v2776_v35  ;;  %v2631_v40 = vpack.c.bf16 %v496_v39, %v493_v36 }
 0x11c   :  { %2389 = vmatpush3.bf16.msra.mxu1 %v2776_v35 }
 0x11d   :  { %2390 = vmatprep.subr.bf16.mxu1 %v2777_v41 }
 0x120   :  { %2391 = vmatpush3.bf16.msra.mxu1 %v2777_v41 }
 0x121   :  { %2632 = vmatprep.subr.bf16.mxu1 %v2631_v40 }
 0x123   :  { %2393 = vmatmul.mubr.bf16.vlgmr.msra.gmra.mrb[4].mxu1 %v2889_v9 }
 0x124   :  { %2634 = vmatpush3.bf16.msra.mxu1 %v2631_v40  ;;  %2424 = vmatprep.mubr.msk.f32.mxu1 %vm166_vm0, %v2974_v42 }
 0x125   :  { %2636 = vmatprep.subr.bf16.mxu1 %v2635_v38 }
 0x128   :  { %2638 = vmatpush3.bf16.msra.mxu1 %v2635_v38 }
 0x129   :  { %2430 = vmatprep.subr.bf16.mxu1 %v2778_v46 }
 0x12b   :  { %2425 = vmatmul.mubr.msk.f32.vlgmr.msra.gmra.mrb[8].mxu1 %vm166_vm0, %v2982_v43 }
 0x12c   :  { %2427 = vmatprep.mubr.msk.f32.mxu1 %vm166_vm0, %v2987_v44  ;;  %2431 = vmatpush3.bf16.msra.mxu1 %v2778_v46 }
 0x12d   :  { %2432 = vmatprep.subr.bf16.mxu1 %v2780_v48 }
 0x12f   :  { %2428 = vmatmul.mubr.msk.f32.gmra.mrb[10].mxu1 %vm166_vm0, %v2996_v45 }
 0x130   :  { %2433 = vmatpush3.bf16.msra.mxu1 %v2780_v48 }
 0x131   :  { %2434 = vmatprep.subr.bf16.mxu1 %v2782_v50 }
 0x134   :  { %2435 = vmatpush3.bf16.msra.mxu1 %v2782_v50  ;;  %v2796_v50 = vld [vmem:[%s3372_s4 + $0x90] sm:$0xff]  }
 0x135   :  { %2436 = vmatprep.subr.bf16.mxu1 %v2784_v52 }
 0x138   :  { %2437 = vmatpush3.bf16.msra.mxu1 %v2784_v52  ;;  %v2801_v52 = vld [vmem:[%s3372_s4 + $0xb8] sm:$0xff]  }
 0x139   :  { %2438 = vmatprep.subr.bf16.mxu1 %v2786_v54 }
 0x13c   :  { %2439 = vmatpush3.bf16.msra.mxu1 %v2786_v54  ;;  %v1386_v54 = vld [vmem:[%s3374_s6 + $0x8] sm:$0xff] }
 0x13d   :  { %2440 = vmatprep.subr.bf16.mxu1 %v2788_v56  ;;  %v2655_v55 = vpack.c.bf16 %v1386_v54, %v1385_v53  ;;  %v1828_v53 = vld [vmem:[%s3376_s8] sm:$0xff]  ;;  %v1829_v54 = vld [vmem:[%s3376_s8 + $0x8] sm:$0xff] }
 0x13f   :  { %2656 = vmatprep.subr.bf16.mxu0 %v2655_v55 }
 0x140   :  { %2441 = vmatpush3.bf16.msra.mxu1 %v2788_v56 }
 0x141   :  { %2442 = vmatprep.subr.bf16.mxu1 %v2790_v58 }
 0x144   :  { %2443 = vmatpush3.bf16.msra.mxu1 %v2790_v58 }
 0x145   :  { %2444 = vmatprep.subr.bf16.mxu1 %v2792_v60 }
 0x148   :  { %2445 = vmatpush3.bf16.msra.mxu1 %v2792_v60 }
 0x1d6   :  { %v2372_v62 = vpop.f32.mrb[0].mxu1 }
 0x1d7   :  { %v245_v63 = vpop.f32.mrb[1].mxu1 }
 0x1da   :  { %v2375_v0 = vpop.f32.mrb[2].mxu1 }
 0x1db   :  { %v255_v1 = vpop.f32.mrb[3].mxu1 }
 0x1f6   :  { %v2394_v2 = vpop.f32.mrb[4].mxu1 }
 0x1f7   :  { %v388_v3 = vadd.f32 %v2394_v2, %v255_v1  ;;  %v367_v5 = vpop.f32.mrb[5].mxu1 }
 0x1f8   :  { %v386_v6 = vadd.f32 %v367_v5, %v245_v63  ;;  %v2395_v7 = vpop.f32.mrb[6].mxu1 }
 0x1f9   :  { %v389_v8 = vadd.f32 %v2395_v7, %v2375_v0  ;;  %v370_v10 = vpop.f32.mrb[7].mxu1  ;;  %v1580_v7 = vld [vmem:[%s3375_s7 + $0x8] sm:$0xff] }
 0x1fa   :  { %v387_v11 = vadd.f32 %v2372_v62, %v370_v10  ;;  %v1387_v10 = vld [vmem:[%s3374_s6 + $0x10] sm:$0xff] }
 0x1fe   :  { %v2426_v12 = vpop.f32.mrb[8].mxu1 }
 0x1ff   :  { %v615_v14 = vadd.f32 %v2426_v12, %v387_v11  ;;  %v591_v15 = vpop.f32.mrb[9].mxu1  ;;  %v1388_v11 = vld [vmem:[%s3374_s6 + $0x18] sm:$0xff] }
 0x200   :  { %v614_v16 = vadd.f32 %v591_v15, %v386_v6  ;;  %v1579_v6 = vld [vmem:[%s3375_s7] sm:$0xff]  ;;  %v2659_v12 = vpack.c.bf16 %v1388_v11, %v1387_v10 }
 0x201   :  { %v634_v17 = vadd.f32 %v2094_v13, %v615_v14  ;;  %v1390_v14 = vld [vmem:[%s3374_s6 + $0x28] sm:$0xff] }
 0x202   :  { %v633_v19 = vadd.f32 %v2094_v13, %v614_v16  ;;  %v2429_v20 = vpop.f32.mrb[10].mxu1  ;;  %v1583_v16 = vld [vmem:[%s3375_s7 + $0x20] sm:$0xff] }
 0x203   :  { %v638_v21 = vmax.f32 %v634_v17, 0.0  ;;  %v617_v22 = vadd.f32 %v2429_v20, %v389_v8  ;;  %v601_v23 = vpop.f32.mrb[11].mxu1  ;;  %v2687_v8 = vpack.c.bf16 %v1580_v7, %v1579_v6  ;;  %v1584_v17 = vld [vmem:[%s3375_s7 + $0x28] sm:$0xff]  ;;  %v1391_v20 = vld [vmem:[%s3374_s6 + $0x30] sm:$0xff]  ;;  %v1673_v6 = vunpack.c.h.bf16 %v2871_v4 }
 0x204   :  { %v637_v24 = vmax.f32 %v633_v19, 0.0  ;;  %v616_v25 = vadd.f32 %v601_v23, %v388_v3  ;;  %v2695_v19 = vpack.c.bf16 %v1584_v17, %v1583_v16  ;;  %v1585_v23 = vld [vmem:[%s3375_s7 + $0x30] sm:$0xff] }
 0x205   :  { %v636_v27 = vadd.f32 %v2094_v13, %v617_v22  ;;  %v1697_v11 = vcombine.high %v1673_v6, %v1673_v6 }
 0x206   :  { %v635_v30 = vadd.f32 %v2094_v13, %v616_v25  ;;  %v641_v31 = vpack.c.bf16 %v638_v21, %v637_v24  ;;  %v1392_v21 = vld [vmem:[%s3374_s6 + $0x38] sm:$0xff] }
 0x207   :  { %v640_v32 = vmax.f32 %v636_v27, 0.0  ;;  %v2667_v22 = vpack.c.bf16 %v1392_v21, %v1391_v20  ;;  %v1586_v24 = vld [vmem:[%s3375_s7 + $0x38] sm:$0xff]  ;;  %v1393_v27 = vld [vmem:[%s3374_s6 + $0x40] sm:$0xff] }
 0x208   :  { %v639_v33 = vmax.f32 %v635_v30, 0.0  ;;  %2446 = vmatprep.mubr.bf16.mxu1 %v641_v31  ;;  %2480 = vmatprep.mubr.bf16.mxu0 %v641_v31  ;;  %v2699_v25 = vpack.c.bf16 %v1586_v24, %v1585_v23  ;;  %v1394_v30 = vld [vmem:[%s3374_s6 + $0x48] sm:$0xff]  ;;  %v2163_v24 = vld [vmem:[%s3377_s5] ss:$0 sm:$0xff] }
 0x20a   :  { %v642_v34 = vpack.c.bf16 %v640_v32, %v639_v33  ;;  %v1587_v32 = vld [vmem:[%s3375_s7 + $0x40] sm:$0xff]  ;;  %v1588_v33 = vld [vmem:[%s3375_s7 + $0x48] sm:$0xff] }
 0x20c   :  { %2447 = vmatmul.mubr.bf16.vlgmr.msra.gmra.mrb[12].mxu1 %v642_v34  ;;  %2481 = vmatmul.mubr.bf16.vlgmr.msra.gmra.mrb[8].mxu0 %v642_v34 }
 0x20d   :  { %2458 = vmatprep.mubr.msk.f32.mxu1 %vm166_vm0, %v2921_v18  ;;  %v2795_v18 = vld [vmem:[%s3372_s4 + $0x88] sm:$0xff]   ;;  %2658 = vmatpush3.bf16.msra.mxu0 %v2655_v55  ;;  %v3201_v55 = vpack.c.bf16 %v1829_v54, %v1828_v53 }
 0x20e   :  { %2660 = vmatprep.subr.bf16.mxu0 %v2659_v12 }
 0x211   :  { %2662 = vmatpush3.bf16.msra.mxu0 %v2659_v12 }
 0x2df   :  { %v2448_v35 = vpop.f32.mrb[12].mxu1  ;;  %v2482_v36 = vpop.f32.mrb[8].mxu0 }
 0x2e0   :  { %v741_v37 = vpop.f32.mrb[13].mxu1  ;;  %v960_v38 = vpop.f32.mrb[9].mxu0 }
 0x2e1   :  { %v2449_v39 = vpop.f32.mrb[14].mxu1  ;;  %v2483_v40 = vpop.f32.mrb[10].mxu0 }
 0x2e2   :  { %v2643_v41 = vpack.c.bf16 %v2449_v39, %v2448_v35  ;;  %v744_v46 = vpop.f32.mrb[15].mxu1  ;;  %v963_v47 = vpop.f32.mrb[11].mxu0  ;;  %v1395_v35 = vld [vmem:[%s3374_s6 + $0x50] sm:$0xff]  ;;  %v1590_v39 = vld [vmem:[%s3375_s7 + $0x58] sm:$0xff] }
 0x2e3   :  { %v2639_v48 = vpack.c.bf16 %v744_v46, %v741_v37  ;;  %v1398_v46 = vld [vmem:[%s3374_s6 + $0x68] sm:$0xff] }
 0x2e5   :  { %2640 = vmatprep.subr.bf16.mxu1 %v2639_v48 }
 0x2e6   :  { %2642 = vmatpush3.bf16.msra.mxu1 %v2639_v48  ;;  %v1591_v48 = vld [vmem:[%s3375_s7 + $0x60] sm:$0xff] }
 0x2e7   :  { %2644 = vmatprep.subr.bf16.mxu1 %v2643_v41 }
 0x2ea   :  { %2646 = vmatpush3.bf16.msra.mxu1 %v2643_v41  ;;  %v1397_v41 = vld [vmem:[%s3374_s6 + $0x60] sm:$0xff] }
 0x2eb   :  { %2484 = vmatprep.subr.bf16.mxu1 %v2794_v49 }
 0x2ed   :  { %2459 = vmatmul.mubr.msk.f32.vlgmr.msra.gmra.mrb[16].mxu1 %vm166_vm0, %v2931_v26  ;;  %v2798_v26 = vld [vmem:[%s3372_s4 + $0xa0] sm:$0xff]  }
 0x2ee   :  { %2485 = vmatpush3.bf16.msra.mxu1 %v2794_v49  ;;  %2461 = vmatprep.mubr.msk.f32.mxu1 %vm166_vm0, %v2939_v28  ;;  %v2799_v28 = vld [vmem:[%s3372_s4 + $0xa8] sm:$0xff]  }
 0x2ef   :  { %2486 = vmatprep.subr.bf16.mxu1 %v2795_v18  ;;  %v1592_v49 = vld [vmem:[%s3375_s7 + $0x68] sm:$0xff] }
 0x2f1   :  { %2462 = vmatmul.mubr.msk.f32.gmra.mrb[18].mxu1 %vm166_vm0, %v2948_v29  ;;  %v2800_v29 = vld [vmem:[%s3372_s4 + $0xb0] sm:$0xff]  }
 0x2f2   :  { %2487 = vmatpush3.bf16.msra.mxu1 %v2795_v18  ;;  %2500 = vmatprep.mubr.bf16.mxu1 %v641_v31  ;;  %v2671_v31 = vpack.c.bf16 %v1394_v30, %v1393_v27  ;;  %v2711_v18 = vpack.c.bf16 %v1592_v49, %v1591_v48 }
 0x2f3   :  { %2488 = vmatprep.subr.bf16.mxu1 %v2796_v50 }
 0x2f6   :  { %2489 = vmatpush3.bf16.msra.mxu1 %v2796_v50  ;;  %v1399_v50 = vld [vmem:[%s3374_s6 + $0x70] sm:$0xff] }
 0x2f7   :  { %2490 = vmatprep.subr.bf16.mxu1 %v2797_v51 }
 0x2fa   :  { %2491 = vmatpush3.bf16.msra.mxu1 %v2797_v51  ;;  %v1400_v51 = vld [vmem:[%s3374_s6 + $0x78] sm:$0xff] }
 0x2fb   :  { %2492 = vmatprep.subr.bf16.mxu1 %v2798_v26 }
 0x2fe   :  { %2493 = vmatpush3.bf16.msra.mxu1 %v2798_v26  ;;  %v2683_v26 = vpack.c.bf16 %v1400_v51, %v1399_v50 }
 0x2ff   :  { %2494 = vmatprep.subr.bf16.mxu1 %v2799_v28 }
 0x302   :  { %2495 = vmatpush3.bf16.msra.mxu1 %v2799_v28  ;;  %v1593_v28 = vld [vmem:[%s3375_s7 + $0x70] sm:$0xff] }
 0x303   :  { %2496 = vmatprep.subr.bf16.mxu1 %v2800_v29 }
 0x306   :  { %2497 = vmatpush3.bf16.msra.mxu1 %v2800_v29  ;;  %v1594_v29 = vld [vmem:[%s3375_s7 + $0x78] sm:$0xff] }
 0x307   :  { %2498 = vmatprep.subr.bf16.mxu1 %v2801_v52 }
 0x30a   :  { %2499 = vmatpush3.bf16.msra.mxu1 %v2801_v52  ;;  %v2715_v52 = vpack.c.bf16 %v1594_v29, %v1593_v28 }
 0x30d   :  { %2501 = vmatmul.mubr.bf16.vlgmr.msra.gmra.mrb[20].mxu1 %v642_v34  ;;  %v2703_v34 = vpack.c.bf16 %v1588_v33, %v1587_v32 }
 0x30e   :  { %2512 = vmatprep.mubr.msk.f32.mxu1 %vm166_vm0, %v2974_v42 }
 0x3c0   :  { %v2460_v56 = vpop.f32.mrb[16].mxu1 }
 0x3c1   :  { %v3091_v57 = vadd.f32 %v2460_v56, %v963_v47  ;;  %v838_v58 = vpop.f32.mrb[17].mxu1  ;;  %v2679_v47 = vpack.c.bf16 %v1398_v46, %v1397_v41  ;;  %v2805_v56 = vmov 1983009808  }
 0x3c2   :  { %v3093_v59 = vadd.f32 %v960_v38, %v838_v58  ;;  %v1589_v38 = vld [vmem:[%s3375_s7 + $0x50] sm:$0xff]  ;;  %v1239_v58 = vunpack.c.l.s4 %v2805_v56 }
 0x3c4   :  { %v2463_v60 = vpop.f32.mrb[18].mxu1 }
 0x3c5   :  { %v3095_v61 = vadd.f32 %v2483_v40, %v2463_v60  ;;  %v848_v42 = vpop.f32.mrb[19].mxu1  ;;  %v2707_v40 = vpack.c.bf16 %v1590_v39, %v1589_v38  ;;  %v1241_v60 = vlaneseq }
 0x3c6   :  { %v3097_v62 = vadd.f32 %v2482_v36, %v848_v42  ;;  %v1396_v36 = vld [vmem:[%s3374_s6 + $0x58] sm:$0xff]  ;;  %v1240_v42 = vunpack.c.0.s8 %v1239_v58 }
 0x3c7   :  { %v2675_v37 = vpack.c.bf16 %v1396_v36, %v1395_v35 }
 0x3e0   :  { %v2502_v63 = vpop.f32.mrb[20].mxu1 }
 0x3e1   :  { %v1086_v0 = vpop.f32.mrb[21].mxu1 }
 0x3e2   :  { %v2503_v1 = vpop.f32.mrb[22].mxu1 }
 0x3e3   :  { %v2651_v2 = vpack.c.bf16 %v2503_v1, %v2502_v63  ;;  %v1089_v3 = vpop.f32.mrb[23].mxu1  ;;  %v1242_v63 = vshrl.u32 %v1241_v60, 7 }
 0x3e4   :  { %v2647_v5 = vpack.c.bf16 %v1089_v3, %v1086_v0  ;;  %v1672_v0 = vunpack.c.l.bf16 %v2871_v4 }
 0x3e5   :  { %v3205_v1 = vsub.s32 %v1240_v42, %v1242_v63 }
 0x3e6   :  { %2648 = vmatprep.subr.bf16.mxu1 %v2647_v5  ;;  %v1680_v3 = vcombine.high %v1672_v0, %v1672_v0 }
 0x3e7   :  { %2650 = vmatpush3.bf16.msra.mxu1 %v2647_v5 }
 0x3e8   :  { %2652 = vmatprep.subr.bf16.mxu1 %v2651_v2  ;;  %v1694_v7 = vrot.slane %v1680_v3, %v3205_v1 }
 0x3ea   :  { %v1696_v12 = vcombine.high %v1694_v7, %v1694_v7 }
 0x3eb   :  { %2654 = vmatpush3.bf16.msra.mxu1 %v2651_v2  ;;  %v1687_v2 = vrot.slane %v1672_v0, %v3205_v1 }
 0x3ec   :  { %2688 = vmatprep.subr.bf16.mxu1 %v2687_v8  ;;  %v2183_v17 = vrot.slane %v1696_v12, 9 }
 0x3ed   :  { %v1695_v5 = vcombine.high %v1687_v2, %v1687_v2 }
 0x3ee   :  { %2513 = vmatmul.mubr.msk.f32.vlgmr.msra.gmra.mrb[24].mxu1 %vm166_vm0, %v2982_v43  ;;  %v1581_v43 = vld [vmem:[%s3375_s7 + $0x10] sm:$0xff]  ;;  %v1815_v30 = vadd.f32 %v2183_v17, %v1696_v12 }
 0x3ef   :  { %2515 = vmatprep.mubr.msk.f32.mxu1 %vm166_vm0, %v2987_v44  ;;  %2690 = vmatpush3.bf16.msra.mxu1 %v2687_v8  ;;  %v1582_v44 = vld [vmem:[%s3375_s7 + $0x18] sm:$0xff]  ;;  %v2180_v8 = vrot.slane %v1687_v2, 9  ;;  %v2181_v10 = vrot.slane %v1695_v5, 9 }
 0x3f0   :  { %v2691_v13 = vpack.c.bf16 %v1582_v44, %v1581_v43  ;;  %v1704_v43 = vrot.slane %v1673_v6, %v3205_v1  ;;  %v2182_v44 = vrot.slane %v1694_v7, 9 }
 0x3f2   :  { %2516 = vmatmul.mubr.msk.f32.gmra.mrb[26].mxu1 %vm166_vm0, %v2996_v45  ;;  %2692 = vmatprep.subr.bf16.mxu1 %v2691_v13  ;;  %v1389_v45 = vld [vmem:[%s3374_s6 + $0x20] sm:$0xff]  ;;  %v1712_v16 = vcombine.high %v1704_v43, %v1704_v43  ;;  %v2184_v20 = vrot.slane %v1704_v43, 9 }
 0x3f3   :  { %2694 = vmatpush3.bf16.msra.mxu1 %v2691_v13  ;;  %v2663_v15 = vpack.c.bf16 %v1390_v14, %v1389_v45  ;;  %v1812_v13 = vadd.f32 %v2180_v8, %v1687_v2  ;;  %v1813_v45 = vadd.f32 %v2181_v10, %v1695_v5  ;;  %v1711_v14 = vrot.slane %v1697_v11, %v3205_v1 }
 0x3f4   :  { %2696 = vmatprep.subr.bf16.mxu1 %v2695_v19  ;;  %v2185_v27 = vrot.slane %v1712_v16, 9  ;;  %v1816_v36 = vadd.f32 %v2184_v20, %v1704_v43 }
 0x3f5   :  { %2664 = vmatprep.subr.bf16.mxu0 %v2663_v15  ;;  %v2186_v35 = vrot.slane %v1711_v14, 9 }
 0x3f6   :  { %2666 = vmatpush3.bf16.msra.mxu0 %v2663_v15  ;;  %v3212_v15 = vsub.s32 0, %v1242_v63 }
 0x3f7   :  { %2698 = vmatpush3.bf16.msra.mxu1 %v2695_v19  ;;  %2668 = vmatprep.subr.bf16.mxu0 %v2667_v22  ;;  %v1814_v19 = vadd.f32 %v2182_v44, %v1694_v7  ;;  %v3235_v50 = vadd.f32 %v2186_v35, %v1711_v14 }
 0x3f8   :  { %2700 = vmatprep.subr.bf16.mxu1 %v2699_v25  ;;  %v1863_v4 = vrot.slane %v1812_v13, %v3212_v15  ;;  %v1867_v21 = vrot.slane %v1813_v45, %v3212_v15  ;;  %v1875_v48 = vrot.slane %v1815_v30, %v3212_v15 }
 0x3f9   :  { %v1871_v33 = vrot.slane %v1814_v19, %v3212_v15 }
 0x3fa   :  { %2670 = vmatpush3.bf16.msra.mxu0 %v2667_v22  ;;  %v3217_v22 = vunpack.c.l.bf16 %v2889_v9  ;;  %v1924_v38 = vsel %vm1481_vm1, %v1867_v21, %v1863_v4 }
 0x3fb   :  { %2702 = vmatpush3.bf16.msra.mxu1 %v2699_v25  ;;  %2672 = vmatprep.subr.bf16.mxu0 %v2671_v31  ;;  %v1713_v25 = vcombine.high %v1711_v14, %v1711_v14  ;;  %v1925_v51 = vsel %vm1483_vm2, %v1871_v33, %v1924_v38  ;;  %v1887_v14 = vrot.slane %v3235_v50, %v3212_v15  ;;  %v2804_v50 = vld [vmem:[%s3370_s0 + $0x8] sm:$0xff]  }
 0x3fc   :  { %2704 = vmatprep.subr.bf16.mxu1 %v2703_v34  ;;  %v3227_v9 = vrot.slane %v3217_v22, %v3205_v1 }
 0x3fe   :  { %2674 = vmatpush3.bf16.msra.mxu0 %v2671_v31 }
 0x3ff   :  { %2706 = vmatpush3.bf16.msra.mxu1 %v2703_v34  ;;  %2676 = vmatprep.subr.bf16.mxu0 %v2675_v37 }
 0x400   :  { %2708 = vmatprep.subr.bf16.mxu1 %v2707_v40 }
 0x402   :  { %2678 = vmatpush3.bf16.msra.mxu0 %v2675_v37 }
 0x403   :  { %2710 = vmatpush3.bf16.msra.mxu1 %v2707_v40  ;;  %2680 = vmatprep.subr.bf16.mxu0 %v2679_v47 }
 0x404   :  { %2712 = vmatprep.subr.bf16.mxu1 %v2711_v18 }
 0x406   :  { %2682 = vmatpush3.bf16.msra.mxu0 %v2679_v47 }
 0x407   :  { %2714 = vmatpush3.bf16.msra.mxu1 %v2711_v18  ;;  %2684 = vmatprep.subr.bf16.mxu0 %v2683_v26 }
 0x408   :  { %2716 = vmatprep.subr.bf16.mxu1 %v2715_v52 }
 0x40a   :  { %2686 = vmatpush3.bf16.msra.mxu0 %v2683_v26 }
 0x40b   :  { %2718 = vmatpush3.bf16.msra.mxu1 %v2715_v52  ;;  %2720 = vmatprep.subr.bf16.mxu0 %v3201_v55  ;;  %v1879_v52 = vrot.slane %v1816_v36, %v3212_v15 }
 0x4c1   :  { %v2514_v23 = vpop.f32.mrb[24].mxu1 }
 0x4c2   :  { %v1207_v31 = vadd.f32 %v2514_v23, %v3091_v57  ;;  %v1183_v32 = vpop.f32.mrb[25].mxu1  ;;  %v2187_v57 = vrot.slane %v1713_v25, 9 }
 0x4c3   :  { %v1206_v34 = vadd.f32 %v1183_v32, %v3093_v59  ;;  %v3231_v59 = vadd.f32 %v2185_v27, %v1712_v16 }
 0x4c4   :  { %v1226_v37 = vadd.f32 %v2163_v24, %v1207_v31  ;;  %v3241_v56 = vadd.f32 %v2187_v57, %v1713_v25 }
 0x4c5   :  { %v1225_v39 = vadd.f32 %v2163_v24, %v1206_v34  ;;  %v2517_v40 = vpop.f32.mrb[26].mxu1  ;;  %v1883_v45 = vrot.slane %v3231_v59, %v3212_v15 }
 0x4c6   :  { %v1230_v41 = vmax.f32 %v1226_v37, 0.0  ;;  %v1209_v46 = vadd.f32 %v2517_v40, %v3095_v61  ;;  %v1193_v47 = vpop.f32.mrb[27].mxu1 }
 0x4c7   :  { %v1229_v49 = vmax.f32 %v1225_v39, 0.0  ;;  %v1208_v18 = vadd.f32 %v1193_v47, %v3097_v62  ;;  %v1926_v62 = vsel %vm1485_vm3, %v1875_v48, %v1925_v51 }
 0x4c8   :  { %v1254_v26 = vcombine.high %v1230_v41, %v1230_v41  ;;  %v1261_v28 = vrot.slane %v1230_v41, %v3205_v1  ;;  %v1228_v29 = vadd.f32 %v2163_v24, %v1209_v46  ;;  %v1927_v20 = vsel %vm1487_vm4, %v1879_v52, %v1926_v62 }
 0x4c9   :  { %v1237_v61 = vcombine.high %v1229_v49, %v1229_v49  ;;  %v1244_v53 = vrot.slane %v1229_v49, %v3205_v1  ;;  %v1227_v54 = vadd.f32 %v2163_v24, %v1208_v18 }
 0x4ca   :  { %v1269_v58 = vcombine.high %v1261_v28, %v1261_v28  ;;  %v2168_v60 = vrot.slane %v1261_v28, 9  ;;  %v1232_v42 = vmax.f32 %v1228_v29, 0.0  ;;  %v1268_v63 = vrot.slane %v1254_v26, %v3205_v1 }
 0x4cb   :  { %v1251_v0 = vrot.slane %v1237_v61, %v3205_v1  ;;  %v1252_v2 = vcombine.high %v1244_v53, %v1244_v53  ;;  %v2164_v3 = vrot.slane %v1244_v53, 9  ;;  %v1231_v8 = vmax.f32 %v1227_v54, 0.0 }
 0x4cc   :  { %v2169_v5 = vrot.slane %v1269_v58, 9  ;;  %v1373_v6 = vmax.f32 %v1261_v28, %v2168_v60  ;;  %v1288_v7 = vcombine.high %v1232_v42, %v1232_v42  ;;  %v1295_v44 = vrot.slane %v1232_v42, %v3205_v1 }
 0x4cd   :  { %v1253_v10 = vcombine.high %v1251_v0, %v1251_v0  ;;  %v2165_v11 = vrot.slane %v1252_v2, 9  ;;  %v2166_v12 = vrot.slane %v1251_v0, 9  ;;  %v1369_v43 = vmax.f32 %v1244_v53, %v2164_v3 }
 0x4ce   :  { %v1302_v13 = vrot.slane %v1288_v7, %v3205_v1  ;;  %v2170_v4 = vrot.slane %v1268_v63, 9  ;;  %v1374_v21 = vmax.f32 %v1269_v58, %v2169_v5  ;;  %v1303_v23 = vcombine.high %v1295_v44, %v1295_v44 }
 0x4cf   :  { %v2167_v16 = vrot.slane %v1253_v10, 9  ;;  %v1370_v17 = vmax.f32 %v1252_v2, %v2165_v11  ;;  %v1371_v19 = vmax.f32 %v1251_v0, %v2166_v12  ;;  %v2176_v24 = vrot.slane %v1295_v44, 9 }
 0x4d0   :  { %v1436_v25 = vrot.slane %v1373_v6, %v3212_v15  ;;  %v1420_v30 = vrot.slane %v1369_v43, %v3212_v15  ;;  %v1271_v31 = vcombine.high %v1231_v8, %v1231_v8  ;;  %v1304_v33 = vcombine.high %v1302_v13, %v1302_v13 }
 0x4d1   :  { %v1372_v27 = vmax.f32 %v1253_v10, %v2167_v16  ;;  %v1424_v32 = vrot.slane %v1370_v17, %v3212_v15  ;;  %v2177_v34 = vrot.slane %v1303_v23, 9  ;;  %v1278_v35 = vrot.slane %v1231_v8, %v3205_v1 }
 0x4d2   :  { %v1428_v36 = vrot.slane %v1371_v19, %v3212_v15  ;;  %v2178_v37 = vrot.slane %v1302_v13, 9  ;;  %v1285_v38 = vrot.slane %v1271_v31, %v3205_v1  ;;  %v1270_v39 = vcombine.high %v1268_v63, %v1268_v63 }
 0x4d3   :  { %v1381_v40 = vmax.f32 %v1295_v44, %v2176_v24  ;;  %v1286_v57 = vcombine.high %v1278_v35, %v1278_v35  ;;  %v2172_v41 = vrot.slane %v1278_v35, 9  ;;  %v1432_v46 = vrot.slane %v1372_v27, %v3212_v15 }
 0x4d4   :  { %v1287_v47 = vcombine.high %v1285_v38, %v1285_v38  ;;  %v2174_v59 = vrot.slane %v1285_v38, 9  ;;  %v2171_v48 = vrot.slane %v1270_v39, 9  ;;  %v1375_v49 = vmax.f32 %v1268_v63, %v2170_v4 }
 0x4d5   :  { %v1382_v18 = vmax.f32 %v1303_v23, %v2177_v34  ;;  %v2173_v51 = vrot.slane %v1286_v57, 9  ;;  %v1377_v26 = vmax.f32 %v1278_v35, %v2172_v41  ;;  %v1482_v28 = vsel %vm1481_vm1, %v1424_v32, %v1420_v30  ;;  %v1831_v23 = vld [vmem:[%s3376_s8 + $0x18] sm:$0xff] }
 0x4d6   :  { %v2175_v29 = vrot.slane %v1287_v47, 9  ;;  %v1379_v52 = vmax.f32 %v1285_v38, %v2174_v59  ;;  %v1376_v61 = vmax.f32 %v1270_v39, %v2171_v48  ;;  %v1484_v53 = vsel %vm1483_vm2, %v1428_v36, %v1482_v28  ;;  %v1832_v38 = vld [vmem:[%s3376_s8 + $0x20] sm:$0xff]  ;;  %v1833_v39 = vld [vmem:[%s3376_s8 + $0x28] sm:$0xff]  ;;  %v1834_v48 = vld [vmem:[%s3376_s8 + $0x30] sm:$0xff] }
 0x4d7   :  { %v1378_v54 = vmax.f32 %v1286_v57, %v2173_v51  ;;  %v1440_v58 = vrot.slane %v1374_v21, %v3212_v15  ;;  %v1486_v60 = vsel %vm1485_vm3, %v1432_v46, %v1484_v53  ;;  %v2179_v42 = vrot.slane %v1304_v33, 9  ;;  %v1830_v21 = vld [vmem:[%s3376_s8 + $0x10] sm:$0xff] }
 0x4d8   :  { %v1380_v62 = vmax.f32 %v1287_v47, %v2175_v29  ;;  %v1460_v0 = vrot.slane %v1379_v52, %v3212_v15  ;;  %v1444_v63 = vrot.slane %v1375_v49, %v3212_v15  ;;  %v1488_v2 = vsel %vm1487_vm4, %v1436_v25, %v1486_v60  ;;  %v1835_v49 = vld [vmem:[%s3376_s8 + $0x38] sm:$0xff]  ;;  %v1836_v52 = vld [vmem:[%s3376_s8 + $0x40] sm:$0xff] }
 0x4d9   :  { %v1452_v3 = vrot.slane %v1377_v26, %v3212_v15  ;;  %v1456_v5 = vrot.slane %v1378_v54, %v3212_v15  ;;  %v1448_v6 = vrot.slane %v1376_v61, %v3212_v15  ;;  %v1490_v7 = vsel %vm1489_vm5, %v1440_v58, %v1488_v2  ;;  %v1837_v61 = vld [vmem:[%s3376_s8 + $0x48] sm:$0xff] }
 0x4da   :  { %v1383_v8 = vmax.f32 %v1302_v13, %v2178_v37  ;;  %v1464_v10 = vrot.slane %v1380_v62, %v3212_v15  ;;  %v1492_v11 = vsel %vm1491_vm6, %v1444_v63, %v1490_v7  ;;  %v1928_v12 = vsel %vm1489_vm5, %v1883_v45, %v1927_v20  ;;  %v1839_v63 = vld [vmem:[%s3376_s8 + $0x58] sm:$0xff] }
 0x4db   :  { %v1714_v43 = vcombine.high %v3217_v22, %v3217_v22  ;;  %v1495_v44 = vsel %vm1481_vm1, %v1456_v5, %v1452_v3  ;;  %v1494_v16 = vsel %vm1493_vm7, %v1448_v6, %v1492_v11  ;;  %v1384_v17 = vmax.f32 %v1304_v33, %v2179_v42  ;;  %v1841_v11 = vld [vmem:[%s3376_s8 + $0x68] sm:$0xff] }
 0x4dc   :  { %v1468_v19 = vrot.slane %v1381_v40, %v3212_v15  ;;  %2550 = vmatprep.mubr.f32.mxu0 %v1494_v16  ;;  %2585 = vmatprep.mubr.f32.mxu1 %v1494_v16  ;;  %v1496_v13 = vsel %vm1483_vm2, %v1460_v0, %v1495_v44  ;;  %v1891_v4 = vrot.slane %v3241_v56, %v3212_v15  ;;  %v2188_v35 = vrot.slane %v3227_v9, 9  ;;  %v1838_v0 = vld [vmem:[%s3376_s8 + $0x50] sm:$0xff] }
 0x4dd   :  { %v1729_v45 = vcombine.high %v3227_v9, %v3227_v9  ;;  %v1472_v20 = vrot.slane %v1382_v18, %v3212_v15  ;;  %v1497_v22 = vsel %vm1485_vm3, %v1464_v10, %v1496_v13  ;;  %v1929_v56 = vsel %vm1491_vm6, %v1887_v14, %v1928_v12  ;;  %v1840_v10 = vld [vmem:[%s3376_s8 + $0x60] sm:$0xff]  ;;  %v1842_v13 = vld [vmem:[%s3376_s8 + $0x70] sm:$0xff] }
 0x4de   :  { %v1476_v24 = vrot.slane %v1383_v8, %v3212_v15  ;;  %v1498_v25 = vsel %vm1487_vm4, %v1468_v19, %v1497_v22  ;;  %v1728_v27 = vrot.slane %v1714_v43, %v3205_v1  ;;  %v1480_v30 = vrot.slane %v1384_v17, %v3212_v15 }
 0x4df   :  { %v1499_v31 = vsel %vm1489_vm5, %v1472_v20, %v1498_v25  ;;  %v2723_v33 = vpack.c.bf16 %v1831_v23, %v1830_v21  ;;  %v1930_v34 = vsel %vm1493_vm7, %v1891_v4, %v1929_v56  ;;  %v1675_v14 = vunpack.c.h.bf16 %v2804_v50  ;;  %v1843_v4 = vld [vmem:[%s3376_s8 + $0x78] sm:$0xff] }
 0x4e0   :  { %v1500_v32 = vsel %vm1491_vm6, %v1476_v24, %v1499_v31  ;;  %v2189_v36 = vrot.slane %v1729_v45, 9  ;;  %v1730_v40 = vcombine.high %v1728_v27, %v1728_v27  ;;  %v2190_v57 = vrot.slane %v1728_v27, 9 }
 0x4e1   :  { %v1501_v37 = vsel %vm1493_vm7, %v1480_v30, %v1500_v32  ;;  %v2727_v41 = vpack.c.bf16 %v1833_v39, %v1832_v38  ;;  %v1738_v46 = vrot.slane %v1675_v14, %v3205_v1  ;;  %v1820_v47 = vadd.f32 %v2188_v35, %v3227_v9 }
 0x4e2   :  { %2551 = vmatmul.mubr.f32.vlgmr.msra.gmra.mrb[12].mxu0 %v1501_v37  ;;  %2586 = vmatmul.mubr.f32.vlgmr.msra.gmra.mrb[28].mxu1 %v1501_v37  ;;  %v1821_v59 = vadd.f32 %v2189_v36, %v1729_v45  ;;  %v1731_v18 = vcombine.high %v1675_v14, %v1675_v14  ;;  %v2191_v51 = vrot.slane %v1730_v40, 9  ;;  %v2731_v26 = vpack.c.bf16 %v1835_v49, %v1834_v48 }
 0x4e3   :  { %2722 = vmatpush3.bf16.msra.mxu0 %v3201_v55  ;;  %2620 = vmatprep.mubr.f32.mxu0 %v1930_v34  ;;  %v1822_v55 = vadd.f32 %v2190_v57, %v1728_v27  ;;  %v1746_v28 = vcombine.high %v1738_v46, %v1738_v46  ;;  %v1895_v29 = vrot.slane %v1820_v47, %v3212_v15  ;;  %v2192_v53 = vrot.slane %v1738_v46, 9 }
 0x4e4   :  { %2724 = vmatprep.subr.bf16.mxu0 %v2723_v33  ;;  %v1899_v9 = vrot.slane %v1821_v59, %v3212_v15  ;;  %v1745_v54 = vrot.slane %v1731_v18, %v3205_v1  ;;  %v1823_v58 = vadd.f32 %v2191_v51, %v1730_v40  ;;  %v2735_v42 = vpack.c.bf16 %v1837_v61, %v1836_v52 }
 0x4e5   :  { %v1903_v60 = vrot.slane %v1822_v55, %v3212_v15  ;;  %v2193_v62 = vrot.slane %v1746_v28, 9  ;;  %v1824_v3 = vadd.f32 %v2192_v53, %v1738_v46  ;;  %v2739_v6 = vpack.c.bf16 %v1839_v63, %v1838_v0 }
 0x4e6   :  { %v1931_v2 = vsel %vm1481_vm1, %v1899_v9, %v1895_v29  ;;  %v1747_v1 = vcombine.high %v1745_v54, %v1745_v54  ;;  %v1907_v5 = vrot.slane %v1823_v58, %v3212_v15  ;;  %v2194_v7 = vrot.slane %v1745_v54, 9 }
 0x4e7   :  { %2726 = vmatpush3.bf16.msra.mxu0 %v2723_v33  ;;  %v1932_v8 = vsel %vm1483_vm2, %v1903_v60, %v1931_v2  ;;  %v1825_v12 = vadd.f32 %v2193_v62, %v1746_v28  ;;  %v1911_v43 = vrot.slane %v1824_v3, %v3212_v15  ;;  %v2743_v17 = vpack.c.bf16 %v1841_v11, %v1840_v10 }
 0x4e8   :  { %2728 = vmatprep.subr.bf16.mxu0 %v2727_v41  ;;  %v2195_v44 = vrot.slane %v1747_v1, 9  ;;  %v1933_v16 = vsel %vm1485_vm3, %v1907_v5, %v1932_v8  ;;  %v1826_v19 = vadd.f32 %v2194_v7, %v1745_v54  ;;  %v2747_v21 = vpack.c.bf16 %v1843_v4, %v1842_v13 }
 0x4e9   :  { %v1915_v45 = vrot.slane %v1825_v12, %v3212_v15  ;;  %v1934_v20 = vsel %vm1487_vm4, %v1911_v43, %v1933_v16 }
 0x4ea   :  { %v1827_v22 = vadd.f32 %v2195_v44, %v1747_v1  ;;  %v1919_v23 = vrot.slane %v1826_v19, %v3212_v15 }
 0x4eb   :  { %2730 = vmatpush3.bf16.msra.mxu0 %v2727_v41  ;;  %v1935_v56 = vsel %vm1489_vm5, %v1915_v45, %v1934_v20 }
 0x4ec   :  { %2732 = vmatprep.subr.bf16.mxu0 %v2731_v26  ;;  %v1923_v24 = vrot.slane %v1827_v22, %v3212_v15  ;;  %v1936_v25 = vsel %vm1491_vm6, %v1919_v23, %v1935_v56 }
 0x4ee   :  { %v1937_v27 = vsel %vm1493_vm7, %v1923_v24, %v1936_v25 }
 0x4ef   :  { %2734 = vmatpush3.bf16.msra.mxu0 %v2731_v26 }
 0x4f0   :  { %2736 = vmatprep.subr.bf16.mxu0 %v2735_v42 }
 0x4f3   :  { %2738 = vmatpush3.bf16.msra.mxu0 %v2735_v42 }
 0x4f4   :  { %2740 = vmatprep.subr.bf16.mxu0 %v2739_v6 }
 0x4f7   :  { %2742 = vmatpush3.bf16.msra.mxu0 %v2739_v6 }
 0x4f8   :  { %2744 = vmatprep.subr.bf16.mxu0 %v2743_v17 }
 0x4fb   :  { %2746 = vmatpush3.bf16.msra.mxu0 %v2743_v17 }
 0x4fc   :  { %2748 = vmatprep.subr.bf16.mxu0 %v2747_v21 }
 0x4ff   :  { %2750 = vmatpush3.bf16.msra.mxu0 %v2747_v21 }
 0x502   :  { %2621 = vmatmul.mubr.f32.vlgmr.msra.gmra.mrb[14].mxu0 %v1937_v27 }
 0x5b5   :  { %v2552_v30 = vpop.f32.mrb[12].mxu0  ;;  %v2587_v31 = vpop.f32.mrb[28].mxu1 }
 0x5b6   :  { %v1671_v32 = vmax.f32 %v2552_v30, %v2587_v31  ;;  %v1570_v33 = vpop.f32.mrb[13].mxu0  ;;  %v1661_v34 = vpop.f32.mrb[29].mxu1 }
 0x5b7   :  { %v1670_v50 = vmax.f32 %v1570_v33, %v1661_v34 }
 0x5d5   :  { %v2622_v14 = vpop.f32.mrb[14].mxu0 }
 0x5d6   :  { %v2016_v35 = vadd.f32 %v2622_v14, %v1671_v32  ;;  %v2006_v36 = vpop.f32.mrb[15].mxu0 }
 0x5d7   :  { %v2015_v37 = vadd.f32 %v2006_v36, %v1670_v50 }
 0x5d8   :  { %2019 = vst.msk [vmem:[%s3378_s9 + $0x8] sm:$0xff] %vm2017_vm8, %v2016_v35 }
 0x5d9   :  { %2018 = vst.msk [vmem:[%s3378_s9] sm:$0xff] %vm2017_vm8, %v2015_v37 }

</bundles_post_ra>
